<compile_context>
chip_gen: v7x
topology: tpu7x:2x2x1
jax: 0.10.0
libtpu: 0.0.40
codegen_flags: <defaults>
</compile_context>

<pallas_src>
import functools

import jax
import jax.numpy as jnp
from jax import lax
from jax.experimental import pallas as pl
from jax.experimental.pallas import tpu as pltpu


# ----------------------------- small helpers ------------------------------- #

def _round_up(x, m):
    return ((x + m - 1) // m) * m


def _cdiv(a, b):
    return (a + b - 1) // b


def _k_tiling(d_in, max_tk):
    """Pick the K (feature) tile.  Returns (tk, nk, d_in_padded)."""
    max_tk = max(128, (max_tk // 128) * 128)
    if d_in <= max_tk:
        return d_in, 1, d_in
    tk = max_tk
    nk = _cdiv(d_in, tk)
    return tk, nk, nk * tk


def _choose_tb(batch, tile_b):
    """Batch tile: multiple of 8 sublanes; >= 2 grid steps when batch allows
    (so the 'parallel' axis actually shards across both v7x TensorCores)."""
    tile_b = max(8, _round_up(tile_b, 8))
    if batch > tile_b:
        return tile_b                      # cdiv(batch, tile_b) >= 2 automatically
    if batch >= 16:
        return _round_up(_cdiv(batch, 2), 8)
    return _round_up(batch, 8)


# ----------------------- one-time parameter packing ------------------------ #

def pack_cbm_params(wc, bc, wy, by, *, max_tk=4096):
    """Pack CBM parameters once (at init, NOT per forward call).

    wc: [D_in, NC] f32, bc: [NC] f32, wy: [NC, NY] f32, by: [NY] f32.
    Returns bf16/f32 tensors padded so the kernel's loads/stores are lane-dense:
      wc_p: [D_in_pad, W] bf16   bc_p: [1, W] f32
      wy_p: [W, W] bf16 (columns shifted by NC)   by_p: [1, W] f32
    where W = round_up(NC + NY, 128) and D_in_pad = nk * tk (zero rows kill any
    garbage lanes from a partial last K block of x).
    """
    d_in, nc = wc.shape
    ny = wy.shape[1]
    W = _round_up(nc + ny, 128)
    _, _, d_in_pad = _k_tiling(d_in, max_tk)

    wc_p = jnp.zeros((d_in_pad, W), jnp.bfloat16).at[:d_in, :nc].set(
        wc.astype(jnp.bfloat16))
    bc_p = jnp.zeros((1, W), jnp.float32).at[:, :nc].set(
        bc.reshape(1, nc).astype(jnp.float32))
    # net_y weights/bias land at lane offset nc -> logits come out of the MXU
    # already sitting in lanes [nc, nc+ny) of the fused output slab.
    wy_p = jnp.zeros((W, W), jnp.bfloat16).at[:nc, nc:nc + ny].set(
        wy.astype(jnp.bfloat16))
    by_p = jnp.zeros((1, W), jnp.float32).at[:, nc:nc + ny].set(
        by.reshape(1, ny).astype(jnp.float32))
    return wc_p, bc_p, wy_p, by_p


# --------------------------------- kernel ---------------------------------- #

def _cbm_kernel(x_ref, wc_ref, bc_ref, wy_ref, by_ref, out_ref, acc_ref,
                *, n_concepts, d_in, tk):
    # x_ref:  [TB, TK] f32 (raw input rows; cast to bf16 here, not in wrapper)
    # wc_ref: [TK, W] bf16   bc_ref: [1, W] f32
    # wy_ref: [W,  W] bf16   by_ref: [1, W] f32
    # out_ref:[TB, W] f32 fused slab: concepts in lanes [0,nc), logits [nc,nc+ny)
    # acc_ref:[TB, W] f32 pre-activation accumulator (scratch, resident over K)
    k = pl.program_id(1)
    nk = pl.num_programs(1)

    @pl.when(k == 0)
    def _init():
        acc_ref[...] = jnp.zeros_like(acc_ref)

    x = x_ref[...]
    if d_in % tk != 0:
        # Last K block is partial: zero out-of-range lanes so stale VMEM garbage
        # (potentially NaN) cannot poison the accumulation.
        col = lax.broadcasted_iota(jnp.int32, x.shape, 1) + k * tk
        x = jnp.where(col < d_in, x, 0.0)

    # net_c matmul: bf16 MXU operands, f32 accumulation.
    acc_ref[...] += jnp.dot(x.astype(jnp.bfloat16), wc_ref[...],
                            preferred_element_type=jnp.float32)

    @pl.when(k == nk - 1)
    def _finalize():
        pre_c = acc_ref[...] + bc_ref[...]
        # Exact, numerically stable sigmoid (EUP exp + f32 divide; mem-bound,
        # so this costs nothing vs. the approx reciprocal and avoids overflow).
        e = jnp.exp(-jnp.abs(pre_c))
        concepts = jnp.where(pre_c >= 0.0, 1.0 / (1.0 + e), e / (1.0 + e))

        # net_y matmul over the concept bottleneck.  wy/by were packed with a
        # column offset of n_concepts, so real logits already occupy lanes
        # [n_concepts, n_concepts + n_classes) of this W-wide slab; padded
        # concept lanes (sigmoid(0)=0.5) only meet zero wy rows.
        logits_slab = jnp.dot(concepts.astype(jnp.bfloat16), wy_ref[...],
                              preferred_element_type=jnp.float32) + by_ref[...]

        lane = lax.broadcasted_iota(jnp.int32, out_ref.shape, 1)
        out_ref[...] = jnp.where(lane < n_concepts, concepts, logits_slab
                                 ).astype(out_ref.dtype)


# -------------------------------- wrapper ----------------------------------- #

def cbm_forward(x, wc_p, bc_p, wy_p, by_p, *, n_concepts, n_classes,
                tile_b=512, max_tk=4096):
    """x: [B, ...] f32 (any trailing shape, flattened).  Params from
    pack_cbm_params.  Returns (concepts [B, NC] f32, y_pred [B, NY] f32)."""
    B = x.shape[0]
    d_in = 1
    for d in x.shape[1:]:
        d_in *= d
    x_flat = x.reshape(B, d_in)          # flatten only — no pad/cast HBM copy

    W = wc_p.shape[1]
    assert n_concepts + n_classes <= W
    tk, nk, d_in_pad = _k_tiling(d_in, max_tk)
    assert wc_p.shape[0] == d_in_pad, (
        "packed wc does not match x feature dim / max_tk")

    tb = _choose_tb(B, tile_b)
    nb = _cdiv(B, tb)

    kernel = functools.partial(_cbm_kernel, n_concepts=n_concepts,
                               d_in=d_in, tk=tk)

    out = pl.pallas_call(
        kernel,
        out_shape=jax.ShapeDtypeStruct((B, W), jnp.float32),
        grid=(nb, nk),
        in_specs=[
            pl.BlockSpec((tb, tk), lambda i, k: (i, k)),   # x rows x K slice (f32)
            pl.BlockSpec((tk, W), lambda i, k: (k, 0)),    # wc K slice (bf16)
            pl.BlockSpec((1, W), lambda i, k: (0, 0)),     # bc resident
            pl.BlockSpec((W, W), lambda i, k: (0, 0)),     # wy resident
            pl.BlockSpec((1, W), lambda i, k: (0, 0)),     # by resident
        ],
        out_specs=pl.BlockSpec((tb, W), lambda i, k: (i, 0)),   # fused lane-dense slab
        scratch_shapes=[pltpu.VMEM((tb, W), jnp.float32)],       # pre_c accumulator
        compiler_params=pltpu.CompilerParams(
            dimension_semantics=("parallel", "arbitrary"),       # batch || , K reduce
            vmem_limit_bytes=48 * 1024 * 1024,                   # explicit; < v7x 64 MiB
        ),
    )(x_flat, wc_p, bc_p, wy_p, by_p)

    concepts = out[:, :n_concepts]
    y_pred = out[:, n_concepts:n_concepts + n_classes]
    return concepts, y_pred


# ---------------------------------- demo ------------------------------------ #

if __name__ == "__main__":
    B, C, H, W_IMG = 2, 4, 16, 16
    D_IN = C * H * W_IMG          # 1024
    N_CONCEPTS = 32
    N_CLASSES = 8

    key = jax.random.PRNGKey(0)
    kx, kwc, kbc, kwy, kby = jax.random.split(key, 5)

    x = jax.random.normal(kx, (B, C, H, W_IMG), dtype=jnp.float32)

    # Deterministic synthetic parameters (PyTorch-like uniform init scale).
    wc = jax.random.uniform(kwc, (D_IN, N_CONCEPTS), minval=-1.0, maxval=1.0) / jnp.sqrt(D_IN)
    bc = jax.random.uniform(kbc, (N_CONCEPTS,), minval=-1.0, maxval=1.0) / jnp.sqrt(D_IN)
    wy = jax.random.uniform(kwy, (N_CONCEPTS, N_CLASSES), minval=-1.0, maxval=1.0) / jnp.sqrt(N_CONCEPTS)
    by = jax.random.uniform(kby, (N_CLASSES,), minval=-1.0, maxval=1.0) / jnp.sqrt(N_CONCEPTS)

    # One-time parameter packing (parameter-init time, not per forward call).
    packed = pack_cbm_params(wc, bc, wy, by)

    fwd = jax.jit(functools.partial(cbm_forward,
                                    n_concepts=N_CONCEPTS, n_classes=N_CLASSES))
    concepts, y_pred = fwd(x, *packed)
    jax.block_until_ready((concepts, y_pred))

    # Pure-JAX f32 reference (same semantics as the PyTorch forward).
    x_flat = x.reshape(B, -1)
    ref_c = jax.nn.sigmoid(x_flat @ wc + bc)
    ref_y = ref_c @ wy + by

    assert concepts.shape == (B, N_CONCEPTS) and y_pred.shape == (B, N_CLASSES)
    assert jnp.allclose(concepts, ref_c, atol=2e-2, rtol=2e-2), \
        f"max concept err {jnp.max(jnp.abs(concepts - ref_c))}"
    assert jnp.allclose(y_pred, ref_y, atol=2e-2, rtol=2e-2), \
        f"max logit err {jnp.max(jnp.abs(y_pred - ref_y))}"

    print("KERNEL_OK")
</pallas_src>

<mosaic_0001>
module attributes {stable_mosaic.version = 11 : i64} {
  func.func @_cbm_kernel(%arg0: i32, %arg1: i32, %arg2: memref<8x1024xf32, #tpu.memory_space<vmem>>, %arg3: memref<1024x128xbf16, #tpu.memory_space<vmem>>, %arg4: memref<1x128xf32, #tpu.memory_space<vmem>>, %arg5: memref<128x128xbf16, #tpu.memory_space<vmem>>, %arg6: memref<1x128xf32, #tpu.memory_space<vmem>>, %arg7: memref<8x128xf32, #tpu.memory_space<vmem>>, %arg8: memref<8x128xf32, #tpu.memory_space<vmem>>) attributes {dimension_semantics = [#tpu.dimension_semantics<parallel>, #tpu.dimension_semantics<arbitrary>], iteration_bounds = array<i64: 1, 1>, scalar_prefetch = 0 : i64, scratch_operands = 1 : i64, tpu.core_type = #tpu.core_type<tc>, window_params = [{transform_indices = @transform_0, window_bounds = array<i64: 8, 1024>}, {transform_indices = @transform_1, window_bounds = array<i64: 1024, 128>}, {pipeline_mode = #tpu.pipeline_mode<synchronous>, transform_indices = @transform_2, window_bounds = array<i64: 1, 128>}, {pipeline_mode = #tpu.pipeline_mode<synchronous>, transform_indices = @transform_3, window_bounds = array<i64: 128, 128>}, {pipeline_mode = #tpu.pipeline_mode<synchronous>, transform_indices = @transform_4, window_bounds = array<i64: 1, 128>}, {transform_indices = @transform_5, window_bounds = array<i64: 8, 128>}]} {
    %c0_i32 = arith.constant 0 : i32
    %0 = arith.cmpi eq, %arg1, %c0_i32 : i32
    %1 = arith.extui %0 : i1 to i32
    %c0_i32_0 = arith.constant 0 : i32
    %2 = arith.cmpi ne, %1, %c0_i32_0 : i32
    scf.if %2 {
      %cst_10 = arith.constant 0.000000e+00 : f32
      %13 = vector.broadcast %cst_10 : f32 to vector<8x128xf32>
      %c0_11 = arith.constant 0 : index
      %c0_12 = arith.constant 0 : index
      %14 = vector.load %arg8[%c0_11, %c0_12] : memref<8x128xf32, #tpu.memory_space<vmem>>, vector<8x128xf32>
      tpu.vector_store %arg8[%c0_11, %c0_12], %13 {strides = array<i32>} : memref<8x128xf32, #tpu.memory_space<vmem>>, vector<8x128xf32>,
    } else {
    }
    %c0 = arith.constant 0 : index
    %c0_1 = arith.constant 0 : index
    %3 = vector.load %arg2[%c0, %c0_1] : memref<8x1024xf32, #tpu.memory_space<vmem>>, vector<8x1024xf32>
    %c0_2 = arith.constant 0 : index
    %c0_3 = arith.constant 0 : index
    %4 = vector.load %arg8[%c0_2, %c0_3] : memref<8x128xf32, #tpu.memory_space<vmem>>, vector<8x128xf32>
    %5 = arith.truncf %3 : vector<8x1024xf32> to vector<8x1024xbf16>
    %c0_4 = arith.constant 0 : index
    %c0_5 = arith.constant 0 : index
    %6 = vector.load %arg3[%c0_4, %c0_5] : memref<1024x128xbf16, #tpu.memory_space<vmem>>, vector<1024x128xbf16>
    %cst = arith.constant dense<0.000000e+00> : vector<8x128xf32>
    %7 = tpu.matmul %5, %6, %cst {dimension_numbers = #tpu.dot_dimension_numbers<[1], [0], [0], [1], [0, 0, 1, 1], [], []>} : vector<8x1024xbf16>, vector<1024x128xbf16>, vector<8x128xf32> -> vector<8x128xf32>
    %8 = arith.addf %4, %7 : vector<8x128xf32>
    %c0_6 = arith.constant 0 : index
    %c0_7 = arith.constant 0 : index
    %9 = vector.load %arg8[%c0_6, %c0_7] : memref<8x128xf32, #tpu.memory_space<vmem>>, vector<8x128xf32>
    tpu.vector_store %arg8[%c0_6, %c0_7], %8 {strides = array<i32>} : memref<8x128xf32, #tpu.memory_space<vmem>>, vector<8x128xf32>,
    %c0_i32_8 = arith.constant 0 : i32
    %10 = arith.cmpi eq, %arg1, %c0_i32_8 : i32
    %11 = arith.extui %10 : i1 to i32
    %c0_i32_9 = arith.constant 0 : i32
    %12 = arith.cmpi ne, %11, %c0_i32_9 : i32
    scf.if %12 {
      %c0_10 = arith.constant 0 : index
      %c0_11 = arith.constant 0 : index
      %13 = vector.load %arg8[%c0_10, %c0_11] : memref<8x128xf32, #tpu.memory_space<vmem>>, vector<8x128xf32>
      %c0_12 = arith.constant 0 : index
      %c0_13 = arith.constant 0 : index
      %14 = vector.load %arg4[%c0_12, %c0_13] : memref<1x128xf32, #tpu.memory_space<vmem>>, vector<1x128xf32>
      %15 = vector.broadcast %14 : vector<1x128xf32> to vector<8x128xf32>
      %16 = arith.addf %13, %15 : vector<8x128xf32>
      %17 = math.absf %16 : vector<8x128xf32>
      %cst_14 = arith.constant 0.000000e+00 : f32
      %18 = vector.broadcast %cst_14 : f32 to vector<8x128xf32>
      %19 = arith.subf %18, %17 : vector<8x128xf32>
      %20 = math.exp %19 : vector<8x128xf32>
      %cst_15 = arith.constant 0.000000e+00 : f32
      %21 = vector.broadcast %cst_15 : f32 to vector<8x128xf32>
      %22 = arith.cmpf oge, %16, %21 : vector<8x128xf32>
      %cst_16 = arith.constant 1.000000e+00 : f32
      %23 = vector.broadcast %cst_16 : f32 to vector<8x128xf32>
      %24 = arith.addf %23, %20 : vector<8x128xf32>
      %cst_17 = arith.constant 1.000000e+00 : f32
      %25 = vector.broadcast %cst_17 : f32 to vector<8x128xf32>
      %26 = arith.divf %25, %24 : vector<8x128xf32>
      %cst_18 = arith.constant 1.000000e+00 : f32
      %27 = vector.broadcast %cst_18 : f32 to vector<8x128xf32>
      %28 = arith.addf %27, %20 : vector<8x128xf32>
      %29 = arith.divf %20, %28 : vector<8x128xf32>
      %30 = arith.select %22, %26, %29 : vector<8x128xi1>, vector<8x128xf32>
      %31 = arith.truncf %30 : vector<8x128xf32> to vector<8x128xbf16>
      %c0_19 = arith.constant 0 : index
      %c0_20 = arith.constant 0 : index
      %32 = vector.load %arg5[%c0_19, %c0_20] : memref<128x128xbf16, #tpu.memory_space<vmem>>, vector<128x128xbf16>
      %cst_21 = arith.constant dense<0.000000e+00> : vector<8x128xf32>
      %33 = tpu.matmul %31, %32, %cst_21 {dimension_numbers = #tpu.dot_dimension_numbers<[1], [0], [0], [1], [0, 0, 1, 1], [], []>} : vector<8x128xbf16>, vector<128x128xbf16>, vector<8x128xf32> -> vector<8x128xf32>
      %c0_22 = arith.constant 0 : index
      %c0_23 = arith.constant 0 : index
      %34 = vector.load %arg6[%c0_22, %c0_23] : memref<1x128xf32, #tpu.memory_space<vmem>>, vector<1x128xf32>
      %35 = vector.broadcast %34 : vector<1x128xf32> to vector<8x128xf32>
      %36 = arith.addf %33, %35 : vector<8x128xf32>
      %37 = tpu.iota {dimensions = array<i32: 1>} : vector<8x128xi32>
      %c32_i32 = arith.constant 32 : i32
      %38 = vector.broadcast %c32_i32 : i32 to vector<8x128xi32>
      %39 = arith.cmpi slt, %37, %38 : vector<8x128xi32>
      %40 = arith.select %39, %30, %36 : vector<8x128xi1>, vector<8x128xf32>
      %c0_24 = arith.constant 0 : index
      %c0_25 = arith.constant 0 : index
      %41 = vector.load %arg7[%c0_24, %c0_25] : memref<8x128xf32, #tpu.memory_space<vmem>>, vector<8x128xf32>
      tpu.vector_store %arg7[%c0_24, %c0_25], %40 {strides = array<i32>} : memref<8x128xf32, #tpu.memory_space<vmem>>, vector<8x128xf32>,
    } else {
    }
    return
  }
  func.func @transform_0(%arg0: i32, %arg1: i32) -> (i32, i32) {
    %c0_i32 = arith.constant 0 : i32
    return %arg0, %arg1 : i32, i32
  }
  func.func @transform_1(%arg0: i32, %arg1: i32) -> (i32, i32) {
    %c0_i32 = arith.constant 0 : i32
    %c0_i32_0 = arith.constant 0 : i32
    return %arg1, %c0_i32 : i32, i32
  }
  func.func @transform_2(%arg0: i32, %arg1: i32) -> (i32, i32) {
    %c0_i32 = arith.constant 0 : i32
    %c0_i32_0 = arith.constant 0 : i32
    %c0_i32_1 = arith.constant 0 : i32
    return %c0_i32, %c0_i32_0 : i32, i32
  }
  func.func @transform_3(%arg0: i32, %arg1: i32) -> (i32, i32) {
    %c0_i32 = arith.constant 0 : i32
    %c0_i32_0 = arith.constant 0 : i32
    %c0_i32_1 = arith.constant 0 : i32
    return %c0_i32, %c0_i32_0 : i32, i32
  }
  func.func @transform_4(%arg0: i32, %arg1: i32) -> (i32, i32) {
    %c0_i32 = arith.constant 0 : i32
    %c0_i32_0 = arith.constant 0 : i32
    %c0_i32_1 = arith.constant 0 : i32
    return %c0_i32, %c0_i32_0 : i32, i32
  }
  func.func @transform_5(%arg0: i32, %arg1: i32) -> (i32, i32) {
    %c0_i32 = arith.constant 0 : i32
    %c0_i32_0 = arith.constant 0 : i32
    return %arg0, %c0_i32 : i32, i32
  }
}

</mosaic_0001>

<bundles_post_ra>
// kernel: cbm_forward.1
= control target key start
LH: loop header
LB: loop body
LE: loop exit
PB: predicated region body
PF: predicated region fallthrough
CT: control target
= control target key end

     0   :  { %10 = vsyncpa [#allocation4], 0  ;;  %s1307_s18 = smov [#allocation3]   ;;  %s1424_s0 = inlined_call_operand.vmem [shape: f32[2,1024], index: 0, kind: input, shape index: {}]   ;;  %s1425_s1 = inlined_call_operand.hbm [shape: bf16[1024,128], index: 1, kind: input, shape index: {}]   ;;  %s1426_s2 = inlined_call_operand.vmem [shape: f32[1,128], index: 2, kind: input, shape index: {}]   ;;  %s1427_s3 = inlined_call_operand.vmem [shape: bf16[128,128], index: 3, kind: input, shape index: {}]   ;;  %s1428_s4 = inlined_call_operand.vmem [shape: f32[1,128], index: 4, kind: input, shape index: {}]   ;;  %s1429_s5 = inlined_call_operand.vmem [shape: f32[2,128], index: 5, kind: output, shape index: {}]  }
   0x1   :  { %s18_s19 = sshll.u32 %s1307_s18, 4  ;;  %s1283_s22 = scalar_lea.hbm %s1425_s1, 8192  ;;  %s19_s19 = int_to_ptr.vmem [resolvable:$true] %s18_s19 }
   0x2   :  { %p1284_p0 = scmp.ne.s32.totalorder %s1425_s1, %s1283_s22  ;;  %p1287_p1 = scmp.lt.u32.totalorder %s1283_s22, %s1425_s1 }
   0x4   :  { %p1289_p2 = pnand %p1287_p1, %p1284_p0 }
   0x6   :  { %1292 = shalt.err (!%p1289_p2)
}
   0x7   :  { %s1293_s27 = scalar_lea.vmem %s19_s19, 8192  ;;  %p1298_p4 = scmp.lt.s32.totalorder %s19_s19, %s19_s19 }
   0x8   :  { %p1294_p3 = scmp.ne.s32.totalorder %s19_s19, %s1293_s27  ;;  %p1299_p5 = scmp.lt.s32.totalorder %s1293_s27, %s1293_s27 }
   0xa   :  { %p1300_p6 = por %p1299_p5, %p1298_p4 }
   0xc   :  { %p1301_p7 = pnand %p1300_p6, %p1294_p3 }
   0xe   :  { %1304 = shalt.err (!%p1301_p7)
}
   0xf   :  { %s1308_s28 = smov 64   ;;  %s1309_s29 = smov 4  }
  0x10   :  { %24 = dma.hbm_to_vmem [thread:$0]  %s1425_s1, 8192, %s19_s19, [#allocation4], %s1308_s28, %s1308_s28, %s1309_s29  }
  0x11   :  { %1305 = dma.done.wait [#allocation4], 8192  }
  0x12   :  { %1306 = vsyncadd [#allocation4], 4294959104  ;;  %v1195_v0 = vld [vmem:[#allocation3 + $0x40] sm:$0xff]   ;;  %v1199_v4 = vld [vmem:[#allocation3 + $0x48] sm:$0xff]   ;;  %v1310_v24 = vmov 1983009808   ;;  %v64_v26 = vlaneseq }
  0x13   :  { %v1196_v1 = vld [vmem:[#allocation3 + $0xc0] sm:$0xff]   ;;  %1072 = vmatprep.subr.bf16.mxu0 %v1195_v0  ;;  %v1200_v5 = vld [vmem:[#allocation3 + $0xc8] sm:$0xff]   ;;  %v1203_v8 = vld [vmem:[#allocation3 + $0x50] sm:$0xff]   ;;  %v62_v25 = vunpack.c.l.s4 %v1310_v24  ;;  %vm1312_vm0 = vmmov 0  }
  0x14   :  { %v1197_v2 = vld [vmem:[#allocation3] sm:$0xff]   ;;  %1094 = vmatprep.subr.bf16.mxu1 %v1196_v1  ;;  %v1201_v6 = vld [vmem:[#allocation3 + $0x8] sm:$0xff]   ;;  %v1204_v9 = vld [vmem:[#allocation3 + $0xd0] sm:$0xff]   ;;  %v65_v32 = vshrl.u32 %v64_v26, 7 }
  0x15   :  { %v1198_v3 = vld [vmem:[#allocation3 + $0x80] sm:$0xff]   ;;  %1073 = vmatpush3.bf16.msra.mxu0 %v1197_v2  ;;  %v1202_v7 = vld [vmem:[#allocation3 + $0x88] sm:$0xff]   ;;  %v1205_v10 = vld [vmem:[#allocation3 + $0x10] sm:$0xff]   ;;  %v63_v31 = vunpack.c.0.s8 %v62_v25 }
  0x16   :  { %1095 = vmatpush3.bf16.msra.mxu1 %v1198_v3  ;;  %1074 = vmatprep.subr.bf16.mxu0 %v1199_v4  ;;  %v1206_v11 = vld [vmem:[#allocation3 + $0x90] sm:$0xff]   ;;  %v1207_v12 = vld [vmem:[#allocation3 + $0x58] sm:$0xff]   ;;  %v1211_v16 = vld [vmem:[#allocation3 + $0x60] sm:$0xff]  }
  0x17   :  { %1096 = vmatprep.subr.bf16.mxu1 %v1200_v5  ;;  %v1208_v13 = vld [vmem:[#allocation3 + $0xd8] sm:$0xff]   ;;  %v1212_v17 = vld [vmem:[#allocation3 + $0xe0] sm:$0xff]   ;;  %v1215_v20 = vld [vmem:[#allocation3 + $0x68] sm:$0xff]   ;;  %v1356_v37 = vsub.s32 %v63_v31, %v65_v32 }
  0x18   :  { %v1209_v14 = vld [vmem:[#allocation3 + $0x18] sm:$0xff]   ;;  %v1213_v18 = vld [vmem:[#allocation3 + $0x20] sm:$0xff]   ;;  %v1216_v21 = vld [vmem:[#allocation3 + $0xe8] sm:$0xff]  }
  0x19   :  { %1075 = vmatpush3.bf16.msra.mxu0 %v1201_v6  ;;  %v1210_v15 = vld [vmem:[#allocation3 + $0x98] sm:$0xff]   ;;  %v1214_v19 = vld [vmem:[#allocation3 + $0xa0] sm:$0xff]   ;;  %v1217_v22 = vld [vmem:[#allocation3 + $0x28] sm:$0xff]  }
  0x1a   :  { %1097 = vmatpush3.bf16.msra.mxu1 %v1202_v7  ;;  %1076 = vmatprep.subr.bf16.mxu0 %v1203_v8  ;;  %v1218_v23 = vld [vmem:[#allocation3 + $0xa8] sm:$0xff]   ;;  %v1219_v27 = vld [vmem:[#allocation3 + $0x70] sm:$0xff]   ;;  %v1223_v33 = vld [vmem:[#allocation3 + $0x78] sm:$0xff]  }
  0x1b   :  { %1098 = vmatprep.subr.bf16.mxu1 %v1204_v9  ;;  %v1220_v28 = vld [vmem:[#allocation3 + $0xf0] sm:$0xff]   ;;  %v1224_v34 = vld [vmem:[#allocation3 + $0xf8] sm:$0xff]   ;;  %v1233_v44 = vld [vmem:[#allocation3 + $0x140] sm:$0xff]  }
  0x1c   :  { %v1221_v29 = vld [vmem:[#allocation3 + $0x30] sm:$0xff]   ;;  %v1225_v35 = vld [vmem:[#allocation3 + $0x38] sm:$0xff]   ;;  %v1234_v47 = vld [vmem:[#allocation3 + $0x1c0] sm:$0xff]  }
  0x1d   :  { %1077 = vmatpush3.bf16.msra.mxu0 %v1205_v10  ;;  %v1222_v30 = vld [vmem:[#allocation3 + $0xb0] sm:$0xff]   ;;  %v1226_v36 = vld [vmem:[#allocation3 + $0xb8] sm:$0xff]   ;;  %v1235_v50 = vld [vmem:[#allocation3 + $0x100] sm:$0xff]  }
  0x1e   :  { %1099 = vmatpush3.bf16.msra.mxu1 %v1206_v11  ;;  %1078 = vmatprep.subr.bf16.mxu0 %v1207_v12  ;;  %v1227_v38 = vld [vmem:[%s1424_s0] ss:$16 sps:$4 sm:$0xff]   ;;  %v1231_v40 = vld [vmem:[%s1424_s0 + $0x4] ss:$16 sps:$4 sm:$0xff]   ;;  %v1237_v56 = vld [vmem:[#allocation3 + $0x148] sm:$0xff]  }
  0x1f   :  { %1100 = vmatprep.subr.bf16.mxu1 %v1208_v13  ;;  %v1229_v39 = vld [vmem:[%s1424_s0 + $0x20] ss:$16 sps:$4 sm:$0xff]   ;;  %v1232_v41 = vld [vmem:[%s1424_s0 + $0x24] ss:$16 sps:$4 sm:$0xff]   ;;  %v67_v42 = vrot.slane %v1227_v38, %v1356_v37  ;;  %v74_v45 = vrot.slane %v1231_v40, %v1356_v37  ;;  %v1238_v59 = vld [vmem:[#allocation3 + $0x1c8] sm:$0xff]  }
  0x20   :  { %v81_v43 = vrot.slane %v1229_v39, %v1356_v37  ;;  %v88_v46 = vrot.slane %v1232_v41, %v1356_v37  ;;  %v1236_v53 = vld [vmem:[#allocation3 + $0x180] sm:$0xff]   ;;  %v1239_v60 = vld [vmem:[#allocation3 + $0x108] sm:$0xff]   ;;  %v1241_v62 = vld [vmem:[#allocation3 + $0x150] sm:$0xff]   ;;  %v1311_v41 = vmov 0.0  }
  0x21   :  { %1079 = vmatpush3.bf16.msra.mxu0 %v1209_v14  ;;  %v1240_v61 = vld [vmem:[#allocation3 + $0x188] sm:$0xff]   ;;  %v1242_v63 = vld [vmem:[#allocation3 + $0x1d0] sm:$0xff]   ;;  %v1245_v2 = vld [vmem:[#allocation3 + $0x158] sm:$0xff]  }
  0x22   :  { %1101 = vmatpush3.bf16.msra.mxu1 %v1210_v15  ;;  %1080 = vmatprep.subr.bf16.mxu0 %v1211_v16  ;;  %v90_v48 = vcombine.high %v67_v42, %v81_v43  ;;  %v89_v49 = vcombine.low %v67_v42, %v81_v43  ;;  %v92_v51 = vcombine.high %v74_v45, %v88_v46  ;;  %v1243_v0 = vld [vmem:[#allocation3 + $0x110] sm:$0xff]   ;;  %v1246_v3 = vld [vmem:[#allocation3 + $0x1d8] sm:$0xff]   ;;  %v1249_v6 = vld [vmem:[#allocation3 + $0x160] sm:$0xff]  }
  0x23   :  { %1102 = vmatprep.subr.bf16.mxu1 %v1212_v17  ;;  %v91_v52 = vcombine.low %v74_v45, %v88_v46  ;;  %v1244_v1 = vld [vmem:[#allocation3 + $0x190] sm:$0xff]   ;;  %v1247_v4 = vld [vmem:[#allocation3 + $0x118] sm:$0xff]   ;;  %v1250_v7 = vld [vmem:[#allocation3 + $0x1e0] sm:$0xff]  }
  0x24   :  { %v138_v54 = vpack.c.bf16 %v90_v48, %v90_v48  ;;  %v137_v55 = vpack.c.bf16 %v89_v49, %v89_v49  ;;  %v140_v57 = vpack.c.bf16 %v92_v51, %v92_v51  ;;  %v1248_v5 = vld [vmem:[#allocation3 + $0x198] sm:$0xff]   ;;  %v1251_v8 = vld [vmem:[#allocation3 + $0x120] sm:$0xff]   ;;  %v1253_v10 = vld [vmem:[#allocation3 + $0x168] sm:$0xff]  }
  0x25   :  { %1081 = vmatpush3.bf16.msra.mxu0 %v1213_v18  ;;  %v139_v58 = vpack.c.bf16 %v91_v52, %v91_v52  ;;  %v1252_v9 = vld [vmem:[#allocation3 + $0x1a0] sm:$0xff]   ;;  %v1254_v11 = vld [vmem:[#allocation3 + $0x1e8] sm:$0xff]   ;;  %v1257_v14 = vld [vmem:[#allocation3 + $0x170] sm:$0xff]  }
  0x26   :  { %1103 = vmatpush3.bf16.msra.mxu1 %v1214_v19  ;;  %1082 = vmatprep.subr.bf16.mxu0 %v1215_v20  ;;  %v1255_v12 = vld [vmem:[#allocation3 + $0x128] sm:$0xff]   ;;  %v1258_v15 = vld [vmem:[#allocation3 + $0x1f0] sm:$0xff]   ;;  %v1261_v18 = vld [vmem:[#allocation3 + $0x178] sm:$0xff]  }
  0x27   :  { %1104 = vmatprep.subr.bf16.mxu1 %v1216_v21  ;;  %689 = vmatprep.mubr.bf16.mxu0 %v138_v54  ;;  %v1256_v13 = vld [vmem:[#allocation3 + $0x1a8] sm:$0xff]   ;;  %v1259_v16 = vld [vmem:[#allocation3 + $0x130] sm:$0xff]   ;;  %v1262_v19 = vld [vmem:[#allocation3 + $0x1f8] sm:$0xff]  }
  0x28   :  { %729 = vmatprep.mubr.bf16.mxu1 %v140_v57  ;;  %v1260_v17 = vld [vmem:[#allocation3 + $0x1b0] sm:$0xff]   ;;  %v1263_v20 = vld [vmem:[#allocation3 + $0x138] sm:$0xff]   ;;  %v1271_v40 = vld [vmem:[%s1427_s3] sm:$0xff]  }
  0x29   :  { %1083 = vmatpush3.bf16.msra.mxu0 %v1217_v22  ;;  %v1264_v21 = vld [vmem:[#allocation3 + $0x1b8] sm:$0xff]   ;;  %v1273_v42 = vld [vmem:[%s1427_s3 + $0x10] sm:$0xff]   ;;  %v1276_v45 = vld [vmem:[%s1427_s3 + $0x28] sm:$0xff]  }
  0x2a   :  { %1105 = vmatpush3.bf16.msra.mxu1 %v1218_v23  ;;  %1084 = vmatprep.subr.bf16.mxu0 %v1219_v27  ;;  %v1265_v22 = vld [vmem:[%s1424_s0 + $0x8] ss:$16 sps:$4 sm:$0xff]   ;;  %v1269_v24 = vld [vmem:[%s1424_s0 + $0xc] ss:$16 sps:$4 sm:$0xff]   ;;  %v1277_v46 = vld [vmem:[%s1427_s3 + $0x30] sm:$0xff]  }
  0x2b   :  { %1106 = vmatprep.subr.bf16.mxu1 %v1220_v28  ;;  %v1267_v23 = vld [vmem:[%s1424_s0 + $0x28] ss:$16 sps:$4 sm:$0xff]   ;;  %v1270_v25 = vld [vmem:[%s1424_s0 + $0x2c] ss:$16 sps:$4 sm:$0xff]   ;;  %v103_v27 = vrot.slane %v1265_v22, %v1356_v37 }
  0x2c   :  { %v117_v28 = vrot.slane %v1267_v23, %v1356_v37  ;;  %v1274_v43 = vld [vmem:[%s1427_s3 + $0x18] sm:$0xff]  }
  0x2d   :  { %1085 = vmatpush3.bf16.msra.mxu0 %v1221_v29  ;;  %v110_v29 = vrot.slane %v1269_v24, %v1356_v37 }
  0x2e   :  { %1107 = vmatpush3.bf16.msra.mxu1 %v1222_v30  ;;  %1086 = vmatprep.subr.bf16.mxu0 %v1223_v33  ;;  %v124_v30 = vrot.slane %v1270_v25, %v1356_v37  ;;  %v126_v31 = vcombine.high %v103_v27, %v117_v28  ;;  %v125_v32 = vcombine.low %v103_v27, %v117_v28  ;;  %v1272_v37 = vld [vmem:[%s1427_s3 + $0x8] sm:$0xff]  }
  0x2f   :  { %1108 = vmatprep.subr.bf16.mxu1 %v1224_v34 }
  0x30   :  { %v128_v33 = vcombine.high %v110_v29, %v124_v30  ;;  %v127_v34 = vcombine.low %v110_v29, %v124_v30 }
  0x31   :  { %1087 = vmatpush3.bf16.msra.mxu0 %v1225_v35  ;;  %v142_v35 = vpack.c.bf16 %v126_v31, %v126_v31 }
  0x32   :  { %1109 = vmatpush3.bf16.msra.mxu1 %v1226_v36  ;;  %1116 = vmatprep.subr.bf16.mxu0 %v1233_v44  ;;  %v141_v36 = vpack.c.bf16 %v125_v32, %v125_v32  ;;  %v144_v38 = vpack.c.bf16 %v128_v33, %v128_v33  ;;  %v143_v39 = vpack.c.bf16 %v127_v34, %v127_v34  ;;  %v1275_v44 = vld [vmem:[%s1427_s3 + $0x20] sm:$0xff]  }
  0x33   :  { %1138 = vmatprep.subr.bf16.mxu1 %v1234_v47  ;;  %v1278_v47 = vld [vmem:[%s1427_s3 + $0x38] sm:$0xff]  }
  0x34   :  { %690 = vmatmul.mubr.bf16.vlgmr.msra.gmra.mrb[0].mxu0 %v137_v55 }
  0x35   :  { %730 = vmatmul.mubr.bf16.vlgmr.msra.gmra.mrb[0].mxu1 %v139_v58  ;;  %1117 = vmatpush3.bf16.msra.mxu0 %v1235_v50 }
  0x36   :  { %1139 = vmatpush3.bf16.msra.mxu1 %v1236_v53  ;;  %1118 = vmatprep.subr.bf16.mxu0 %v1237_v56 }
  0x37   :  { %1140 = vmatprep.subr.bf16.mxu1 %v1238_v59  ;;  %769 = vmatprep.mubr.bf16.mxu0 %v142_v35 }
  0x38   :  { %809 = vmatprep.mubr.bf16.mxu1 %v144_v38 }
  0x39   :  { %1119 = vmatpush3.bf16.msra.mxu0 %v1239_v60 }
  0x3a   :  { %1141 = vmatpush3.bf16.msra.mxu1 %v1240_v61  ;;  %1120 = vmatprep.subr.bf16.mxu0 %v1241_v62 }
  0x3b   :  { %1142 = vmatprep.subr.bf16.mxu1 %v1242_v63 }
  0x3d   :  { %1121 = vmatpush3.bf16.msra.mxu0 %v1243_v0 }
  0x3e   :  { %1143 = vmatpush3.bf16.msra.mxu1 %v1244_v1  ;;  %1122 = vmatprep.subr.bf16.mxu0 %v1245_v2 }
  0x3f   :  { %1144 = vmatprep.subr.bf16.mxu1 %v1246_v3 }
  0x41   :  { %1123 = vmatpush3.bf16.msra.mxu0 %v1247_v4 }
  0x42   :  { %1145 = vmatpush3.bf16.msra.mxu1 %v1248_v5  ;;  %1124 = vmatprep.subr.bf16.mxu0 %v1249_v6  ;;  %v1062_v6 = vld [vmem:[%s1426_s2] ss:$0 sm:$0xff] }
  0x43   :  { %1146 = vmatprep.subr.bf16.mxu1 %v1250_v7 }
  0x45   :  { %1125 = vmatpush3.bf16.msra.mxu0 %v1251_v8 }
  0x46   :  { %1147 = vmatpush3.bf16.msra.mxu1 %v1252_v9  ;;  %1126 = vmatprep.subr.bf16.mxu0 %v1253_v10 }
  0x47   :  { %1148 = vmatprep.subr.bf16.mxu1 %v1254_v11 }
  0x49   :  { %1127 = vmatpush3.bf16.msra.mxu0 %v1255_v12 }
  0x4a   :  { %1149 = vmatpush3.bf16.msra.mxu1 %v1256_v13  ;;  %1128 = vmatprep.subr.bf16.mxu0 %v1257_v14 }
  0x4b   :  { %1150 = vmatprep.subr.bf16.mxu1 %v1258_v15 }
  0x4d   :  { %1129 = vmatpush3.bf16.msra.mxu0 %v1259_v16 }
  0x4e   :  { %1151 = vmatpush3.bf16.msra.mxu1 %v1260_v17  ;;  %1130 = vmatprep.subr.bf16.mxu0 %v1261_v18  ;;  %v954_v18 = vand.u32 127, %v64_v26 }
  0x4f   :  { %1152 = vmatprep.subr.bf16.mxu1 %v1262_v19  ;;  %v1063_v19 = vld [vmem:[%s1428_s4] ss:$0 sm:$0xff] }
  0x50   :  { %vm955_vm2 = vcmp.lt.s32.totalorder %v954_v18, 32 }
  0x51   :  { %1131 = vmatpush3.bf16.msra.mxu0 %v1263_v20 }
  0x52   :  { %1153 = vmatpush3.bf16.msra.mxu1 %v1264_v21  ;;  %1169 = vmatprep.subr.bf16.mxu0 %v1311_v41 }
  0x54   :  { %770 = vmatmul.mubr.bf16.vlgmr.msra.gmra.mrb[4].mxu0 %v141_v36 }
  0x55   :  { %810 = vmatmul.mubr.bf16.vlgmr.msra.gmra.mrb[4].mxu1 %v143_v39  ;;  %1170 = vmatpush3.bf16.msra.mxu0 %v1271_v40 }
  0x56   :  { %1171 = vmatprep.subr.bf16.mxu0 %v1311_v41  ;;  %1185 = vmatprep.mubr.msk.bf16.mxu0 %vm1312_vm0, %v1311_v41 }
  0x59   :  { %1172 = vmatpush3.bf16.msra.mxu0 %v1272_v37 }
  0x5a   :  { %1173 = vmatprep.subr.bf16.mxu0 %v1311_v41 }
  0x5d   :  { %1174 = vmatpush3.bf16.msra.mxu0 %v1273_v42 }
  0x5e   :  { %1175 = vmatprep.subr.bf16.mxu0 %v1311_v41 }
  0x61   :  { %1176 = vmatpush3.bf16.msra.mxu0 %v1274_v43 }
  0x62   :  { %1177 = vmatprep.subr.bf16.mxu0 %v1311_v41 }
  0x65   :  { %1178 = vmatpush3.bf16.msra.mxu0 %v1275_v44 }
  0x66   :  { %1179 = vmatprep.subr.bf16.mxu0 %v1311_v41 }
  0x69   :  { %1180 = vmatpush3.bf16.msra.mxu0 %v1276_v45 }
  0x6a   :  { %1181 = vmatprep.subr.bf16.mxu0 %v1311_v41 }
  0x6d   :  { %1182 = vmatpush3.bf16.msra.mxu0 %v1277_v46 }
  0x6e   :  { %1183 = vmatprep.subr.bf16.mxu0 %v1311_v41 }
  0x71   :  { %1184 = vmatpush3.bf16.msra.mxu0 %v1278_v47 }
 0x107   :  { %v1088_v48 = vpop.f32.mrb[0].mxu0 }
 0x108   :  { %v1110_v49 = vpop.f32.mrb[0].mxu1  ;;  %v1089_v50 = vpop.f32.mrb[1].mxu0 }
 0x109   :  { %v1090_v51 = vadd.f32 %v1089_v50, %v1088_v48  ;;  %v1111_v52 = vpop.f32.mrb[1].mxu1  ;;  %v1091_v53 = vpop.f32.mrb[2].mxu0 }
 0x10a   :  { %v1112_v54 = vadd.f32 %v1111_v52, %v1110_v49  ;;  %v1113_v55 = vpop.f32.mrb[2].mxu1  ;;  %v1092_v56 = vpop.f32.mrb[3].mxu0 }
 0x10b   :  { %v1114_v57 = vpop.f32.mrb[3].mxu1 }
 0x10c   :  { %v732_v58 = vadd.f32 %v1112_v54, %v1090_v51 }
 0x127   :  { %v1132_v59 = vpop.f32.mrb[4].mxu0 }
 0x128   :  { %v1154_v60 = vpop.f32.mrb[4].mxu1  ;;  %v1133_v61 = vpop.f32.mrb[5].mxu0 }
 0x129   :  { %v1134_v62 = vadd.f32 %v1133_v61, %v1132_v59  ;;  %v1155_v63 = vpop.f32.mrb[5].mxu1  ;;  %v1135_v0 = vpop.f32.mrb[6].mxu0 }
 0x12a   :  { %v1156_v1 = vadd.f32 %v1155_v63, %v1154_v60  ;;  %v1157_v2 = vpop.f32.mrb[6].mxu1  ;;  %v1136_v3 = vpop.f32.mrb[7].mxu0 }
 0x12b   :  { %v772_v4 = vadd.f32 %v1134_v62, %v732_v58  ;;  %v1158_v5 = vpop.f32.mrb[7].mxu1 }
 0x12d   :  { %v812_v7 = vadd.f32 %v1156_v1, %v772_v4 }
 0x12f   :  { %v830_v8 = vadd.f32 %v1062_v6, %v812_v7 }
 0x131   :  { %v831_v9 = vand.u32 2147483647, %v830_v8  ;;  %vm835_vm1 = vcmp.ge.f32.partialorder %v830_v8, 0.0 }
 0x133   :  { %v832_v10 = vsub.f32 0.0, %v831_v9 }
 0x135   :  { %v833_v11 = vmul.f32 1.442695, %v832_v10 }
 0x137   :  { %1279 = vpow2.f32 %v833_v11 }
 0x141   :  { %v1280_v12 = vpop.eup %1279 }
 0x142   :  { %v836_v13 = vadd.f32 1.0, %v1280_v12 }
 0x144   :  { %1281 = vrcp.f32 %v836_v13 }
 0x14e   :  { %v1282_v14 = vpop.eup %1281 }
 0x14f   :  { %v839_v15 = vmul.f32 %v1282_v14, %v1280_v12 }
 0x151   :  { %v840_v16 = vsel %vm835_vm1, %v1282_v14, %v839_v15 }
 0x152   :  { %v841_v17 = vpack.c.bf16 %v840_v16, %v840_v16 }
 0x154   :  { %1186 = vmatmul.mubr.bf16.vlgmr.msra.gmra.mrb[8].mxu0 %v841_v17 }
 0x227   :  { %v947_v20 = vpop.f32.mrb[8].mxu0 }
 0x228   :  { %v948_v21 = vadd.f32 %v1063_v19, %v947_v20  ;;  %v1187_v22 = vpop.f32.mrb[9].mxu0 }
 0x229   :  { %v950_v23 = vpop.f32.mrb[10].mxu0 }
 0x22a   :  { %v956_v24 = vsel %vm955_vm2, %v840_v16, %v948_v21  ;;  %v1188_v25 = vpop.f32.mrb[11].mxu0 }
 0x22b   :  { %957 = vst [vmem:[#allocation5] sm:$0xff] %v956_v24 }
 0x232   :  { %v975_v27 = vld [vmem:[#allocation5] sm:$0x3] }
 0x233   :  { %976 = vst [vmem:[%s1429_s5] sm:$0x3] %v975_v27 }
 0x234   :  { %993 = vsyncpa [#allocation4], 1 }

</bundles_post_ra>
